<compile_context>
chip_gen: v7x
topology: tpu7x:2x2x1
jax: 0.10.0
libtpu: 0.0.40
codegen_flags: <defaults>
</compile_context>

<pallas_src>
import functools
import math

import jax
import jax.numpy as jnp
import numpy as np
from jax.experimental import pallas as pl
from jax.experimental.pallas import tpu as pltpu


def _round_up(x, n):
    return ((x + n - 1) // n) * n


def prediction_kernel(x_ref, w1_ref, b1_ref, w2_ref, b2_ref, w3_ref, b3_ref,
                      o_ref):
    # TODO(synk): training-mode dropout (pltpu.prng_seed + stateful_bernoulli)
    # is not implemented; this kernel matches PyTorch eval() semantics.
    x = x_ref[...]

    # linear1 + ReLU  (f32 MXU accumulation; cast back so bf16 inputs keep
    # bf16 feeds into the next matmul)
    h1 = jnp.dot(x, w1_ref[...], preferred_element_type=jnp.float32)
    h1 = jnp.maximum(h1 + b1_ref[...], 0.0).astype(x.dtype)

    # linear2 + ReLU
    h2 = jnp.dot(h1, w2_ref[...], preferred_element_type=jnp.float32)
    h2 = jnp.maximum(h2 + b2_ref[...], 0.0).astype(x.dtype)

    # linear3 (scalar head)
    y = jnp.dot(h2, w3_ref[...], preferred_element_type=jnp.float32)
    o_ref[...] = (y + b3_ref[...]).astype(o_ref.dtype)


@functools.partial(jax.jit, static_argnames=("tile_m",))
def prediction_layer(x, w1, b1, w2, b2, w3, b3, *, tile_m=256):
    """x: (..., hidden); w1: (hidden, hidden//2); w2: (hidden//2, hidden//4);
    w3: (hidden//4, 1).  Returns (..., 1)."""
    *lead, hidden = x.shape
    h2d = w1.shape[1]
    h4d = w2.shape[1]
    m = math.prod(lead) if lead else 1

    # Large row tiles (multiple of 8), clamped so tiny inputs don't over-pad.
    tile_m = max(8, min(int(tile_m), _round_up(m, 8)))
    tile_m = _round_up(tile_m, 8)
    m_pad = _round_up(m, tile_m)

    x2d = x.reshape(m, hidden)
    if m_pad != m:
        x2d = jnp.pad(x2d, ((0, m_pad - m), (0, 0)))

    b1r = b1.reshape(1, h2d)
    b2r = b2.reshape(1, h4d)
    b3r = b3.reshape(1, 1)

    itemsize = x.dtype.itemsize
    weight_bytes = (w1.size + w2.size + w3.size
                    + b1.size + b2.size + b3.size) * itemsize
    tile_bytes = tile_m * (hidden + 1) * itemsize          # x tile + out tile
    interm_bytes = tile_m * (hidden + h2d + h4d) * 4       # f32 intermediates
    vmem_needed = 2 * weight_bytes + 2 * tile_bytes + interm_bytes
    vmem_limit = int(min(max(int(vmem_needed * 1.5), 16 * 1024 * 1024),
                         64 * 1024 * 1024))

    flops = 2 * m_pad * (hidden * h2d + h2d * h4d + h4d)
    bytes_accessed = (m_pad * hidden + m_pad) * itemsize + weight_bytes
    cost = pl.CostEstimate(flops=flops, transcendentals=0,
                           bytes_accessed=bytes_accessed)

    out2d = pl.pallas_call(
        prediction_kernel,
        out_shape=jax.ShapeDtypeStruct((m_pad, 1), x.dtype),
        grid_spec=pltpu.PrefetchScalarGridSpec(
            num_scalar_prefetch=0,
            grid=(m_pad // tile_m,),
            in_specs=[
                pl.BlockSpec((tile_m, hidden), lambda i: (i, 0)),  # x tile
                pl.BlockSpec((hidden, h2d), lambda i: (0, 0)),     # w1 (whole)
                pl.BlockSpec((1, h2d), lambda i: (0, 0)),          # b1
                pl.BlockSpec((h2d, h4d), lambda i: (0, 0)),        # w2 (whole)
                pl.BlockSpec((1, h4d), lambda i: (0, 0)),          # b2
                pl.BlockSpec((h4d, 1), lambda i: (0, 0)),          # w3 (whole)
                pl.BlockSpec((1, 1), lambda i: (0, 0)),            # b3
            ],
            out_specs=pl.BlockSpec((tile_m, 1), lambda i: (i, 0)),
        ),
        compiler_params=pltpu.CompilerParams(
            dimension_semantics=("parallel",),
            vmem_limit_bytes=vmem_limit,
        ),
        cost_estimate=cost,
    )(x2d, w1, b1r, w2, b2r, w3, b3r)

    return out2d[:m].reshape(*lead, 1)


if __name__ == "__main__":
    batch, seq, hidden_dim = 2, 8, 128   # hidden must be divisible by 4
    h2d, h4d = hidden_dim // 2, hidden_dim // 4

    key = jax.random.PRNGKey(0)
    kx, kw1, kb1, kw2, kb2, kw3, kb3 = jax.random.split(key, 7)

    x = jax.random.normal(kx, (batch, seq, hidden_dim), dtype=jnp.float32)

    def linear_params(kw, kb, fan_in, fan_out):
        # nn.Linear init: U(-1/sqrt(fan_in), 1/sqrt(fan_in)); weight stored
        # transposed, i.e. (fan_in, fan_out).
        bound = 1.0 / np.sqrt(fan_in)
        w = jax.random.uniform(kw, (fan_in, fan_out), jnp.float32,
                               minval=-bound, maxval=bound)
        b = jax.random.uniform(kb, (fan_out,), jnp.float32,
                               minval=-bound, maxval=bound)
        return w, b

    w1, b1 = linear_params(kw1, kb1, hidden_dim, h2d)
    w2, b2 = linear_params(kw2, kb2, h2d, h4d)
    w3, b3 = linear_params(kw3, kb3, h4d, 1)

    out = prediction_layer(x, w1, b1, w2, b2, w3, b3)
    jax.block_until_ready(out)

    # Reference (eval-mode dropout == identity), plain JAX.
    h = jnp.maximum(x @ w1 + b1, 0.0)
    h = jnp.maximum(h @ w2 + b2, 0.0)
    ref = h @ w3 + b3
    np.testing.assert_allclose(np.asarray(out), np.asarray(ref),
                               rtol=1e-5, atol=1e-5)
    assert out.shape == (batch, seq, 1)

    print("KERNEL_OK")
</pallas_src>

<mosaic_0001>
module attributes {stable_mosaic.version = 11 : i64} {
  func.func @prediction_kernel(%arg0: i32, %arg1: memref<16x128xf32, #tpu.memory_space<vmem>>, %arg2: memref<128x64xf32, #tpu.memory_space<vmem>>, %arg3: memref<1x64xf32, #tpu.memory_space<vmem>>, %arg4: memref<64x32xf32, #tpu.memory_space<vmem>>, %arg5: memref<1x32xf32, #tpu.memory_space<vmem>>, %arg6: memref<32x1xf32, #tpu.memory_space<vmem>>, %arg7: memref<1x1xf32, #tpu.memory_space<vmem>>, %arg8: memref<16x1xf32, #tpu.memory_space<vmem>>) attributes {dimension_semantics = [#tpu.dimension_semantics<parallel>], iteration_bounds = array<i64: 1>, scalar_prefetch = 0 : i64, scratch_operands = 0 : i64, tpu.core_type = #tpu.core_type<tc>, window_params = [{transform_indices = @transform_0, window_bounds = array<i64: 16, 128>}, {pipeline_mode = #tpu.pipeline_mode<synchronous>, transform_indices = @transform_1, window_bounds = array<i64: 128, 64>}, {pipeline_mode = #tpu.pipeline_mode<synchronous>, transform_indices = @transform_2, window_bounds = array<i64: 1, 64>}, {pipeline_mode = #tpu.pipeline_mode<synchronous>, transform_indices = @transform_3, window_bounds = array<i64: 64, 32>}, {pipeline_mode = #tpu.pipeline_mode<synchronous>, transform_indices = @transform_4, window_bounds = array<i64: 1, 32>}, {pipeline_mode = #tpu.pipeline_mode<synchronous>, transform_indices = @transform_5, window_bounds = array<i64: 32, 1>}, {pipeline_mode = #tpu.pipeline_mode<synchronous>, transform_indices = @transform_6, window_bounds = array<i64: 1, 1>}, {transform_indices = @transform_7, window_bounds = array<i64: 16, 1>}]} {
    %c0 = arith.constant 0 : index
    %c0_0 = arith.constant 0 : index
    %0 = vector.load %arg1[%c0, %c0_0] : memref<16x128xf32, #tpu.memory_space<vmem>>, vector<16x128xf32>
    %c0_1 = arith.constant 0 : index
    %c0_2 = arith.constant 0 : index
    %1 = vector.load %arg2[%c0_1, %c0_2] : memref<128x64xf32, #tpu.memory_space<vmem>>, vector<128x64xf32>
    %cst = arith.constant dense<0.000000e+00> : vector<16x64xf32>
    %2 = tpu.matmul %0, %1, %cst {dimension_numbers = #tpu.dot_dimension_numbers<[1], [0], [0], [1], [0, 0, 1, 1], [], []>} : vector<16x128xf32>, vector<128x64xf32>, vector<16x64xf32> -> vector<16x64xf32>
    %c0_3 = arith.constant 0 : index
    %c0_4 = arith.constant 0 : index
    %3 = vector.load %arg3[%c0_3, %c0_4] : memref<1x64xf32, #tpu.memory_space<vmem>>, vector<1x64xf32>
    %4 = vector.broadcast %3 : vector<1x64xf32> to vector<16x64xf32>
    %5 = arith.addf %2, %4 : vector<16x64xf32>
    %cst_5 = arith.constant 0.000000e+00 : f32
    %6 = vector.broadcast %cst_5 : f32 to vector<16x64xf32>
    %7 = arith.maximumf %5, %6 : vector<16x64xf32>
    %c0_6 = arith.constant 0 : index
    %c0_7 = arith.constant 0 : index
    %8 = vector.load %arg4[%c0_6, %c0_7] : memref<64x32xf32, #tpu.memory_space<vmem>>, vector<64x32xf32>
    %cst_8 = arith.constant dense<0.000000e+00> : vector<16x32xf32>
    %9 = tpu.matmul %7, %8, %cst_8 {dimension_numbers = #tpu.dot_dimension_numbers<[1], [0], [0], [1], [0, 0, 1, 1], [], []>} : vector<16x64xf32>, vector<64x32xf32>, vector<16x32xf32> -> vector<16x32xf32>
    %c0_9 = arith.constant 0 : index
    %c0_10 = arith.constant 0 : index
    %10 = vector.load %arg5[%c0_9, %c0_10] : memref<1x32xf32, #tpu.memory_space<vmem>>, vector<1x32xf32>
    %11 = vector.broadcast %10 : vector<1x32xf32> to vector<16x32xf32>
    %12 = arith.addf %9, %11 : vector<16x32xf32>
    %cst_11 = arith.constant 0.000000e+00 : f32
    %13 = vector.broadcast %cst_11 : f32 to vector<16x32xf32>
    %14 = arith.maximumf %12, %13 : vector<16x32xf32>
    %c0_12 = arith.constant 0 : index
    %c0_13 = arith.constant 0 : index
    %15 = vector.load %arg6[%c0_12, %c0_13] : memref<32x1xf32, #tpu.memory_space<vmem>>, vector<32x1xf32>
    %cst_14 = arith.constant dense<0.000000e+00> : vector<16x1xf32>
    %16 = tpu.matmul %14, %15, %cst_14 {dimension_numbers = #tpu.dot_dimension_numbers<[1], [0], [0], [1], [0, 0, 1, 1], [], []>} : vector<16x32xf32>, vector<32x1xf32>, vector<16x1xf32> -> vector<16x1xf32>
    %c0_15 = arith.constant 0 : index
    %c0_16 = arith.constant 0 : index
    %17 = vector.load %arg7[%c0_15, %c0_16] : memref<1x1xf32, #tpu.memory_space<vmem>>, vector<1x1xf32>
    %18 = vector.broadcast %17 : vector<1x1xf32> to vector<16x1xf32>
    %19 = arith.addf %16, %18 : vector<16x1xf32>
    %c0_17 = arith.constant 0 : index
    %c0_18 = arith.constant 0 : index
    %20 = vector.load %arg8[%c0_17, %c0_18] : memref<16x1xf32, #tpu.memory_space<vmem>>, vector<16x1xf32>
    tpu.vector_store %arg8[%c0_17, %c0_18], %19 {strides = array<i32>} : memref<16x1xf32, #tpu.memory_space<vmem>>, vector<16x1xf32>,
    return
  }
  func.func @transform_0(%arg0: i32) -> (i32, i32) {
    %c0_i32 = arith.constant 0 : i32
    %c0_i32_0 = arith.constant 0 : i32
    return %arg0, %c0_i32 : i32, i32
  }
  func.func @transform_1(%arg0: i32) -> (i32, i32) {
    %c0_i32 = arith.constant 0 : i32
    %c0_i32_0 = arith.constant 0 : i32
    %c0_i32_1 = arith.constant 0 : i32
    return %c0_i32, %c0_i32_0 : i32, i32
  }
  func.func @transform_2(%arg0: i32) -> (i32, i32) {
    %c0_i32 = arith.constant 0 : i32
    %c0_i32_0 = arith.constant 0 : i32
    %c0_i32_1 = arith.constant 0 : i32
    return %c0_i32, %c0_i32_0 : i32, i32
  }
  func.func @transform_3(%arg0: i32) -> (i32, i32) {
    %c0_i32 = arith.constant 0 : i32
    %c0_i32_0 = arith.constant 0 : i32
    %c0_i32_1 = arith.constant 0 : i32
    return %c0_i32, %c0_i32_0 : i32, i32
  }
  func.func @transform_4(%arg0: i32) -> (i32, i32) {
    %c0_i32 = arith.constant 0 : i32
    %c0_i32_0 = arith.constant 0 : i32
    %c0_i32_1 = arith.constant 0 : i32
    return %c0_i32, %c0_i32_0 : i32, i32
  }
  func.func @transform_5(%arg0: i32) -> (i32, i32) {
    %c0_i32 = arith.constant 0 : i32
    %c0_i32_0 = arith.constant 0 : i32
    %c0_i32_1 = arith.constant 0 : i32
    return %c0_i32, %c0_i32_0 : i32, i32
  }
  func.func @transform_6(%arg0: i32) -> (i32, i32) {
    %c0_i32 = arith.constant 0 : i32
    %c0_i32_0 = arith.constant 0 : i32
    %c0_i32_1 = arith.constant 0 : i32
    return %c0_i32, %c0_i32_0 : i32, i32
  }
  func.func @transform_7(%arg0: i32) -> (i32, i32) {
    %c0_i32 = arith.constant 0 : i32
    %c0_i32_0 = arith.constant 0 : i32
    return %arg0, %c0_i32 : i32, i32
  }
}

</mosaic_0001>

<bundles_post_ra>
// kernel: prediction_layer.1
= control target key start
LH: loop header
LB: loop body
LE: loop exit
PB: predicated region body
PF: predicated region fallthrough
CT: control target
= control target key end

     0   :  { %vm145_vm0 = vcmask 523264   ;;  %vm240_vm1 = vcmask 261120   ;;  %vm322_vm2 = vcmask 7168   ;;  %s636_s1 = inlined_call_operand.vmem [shape: f32[128,64], index: 1, kind: input, shape index: {}]   ;;  %s637_s0 = inlined_call_operand.vmem [shape: f32[16,128], index: 0, kind: input, shape index: {}]   ;;  %s638_s3 = inlined_call_operand.vmem [shape: f32[64,32], index: 3, kind: input, shape index: {}]   ;;  %s639_s5 = inlined_call_operand.vmem [shape: f32[32,1], index: 5, kind: input, shape index: {}]   ;;  %s640_s2 = inlined_call_operand.vmem [shape: f32[1,64], index: 2, kind: input, shape index: {}]   ;;  %s641_s6 = inlined_call_operand.<no memory space> [shape: f32[1,1], index: 6, kind: input, shape index: {}]   ;;  %s642_s4 = inlined_call_operand.vmem [shape: f32[1,32], index: 4, kind: input, shape index: {}]   ;;  %s643_s7 = inlined_call_operand.vmem [shape: f32[16,1], index: 7, kind: output, shape index: {}]  }
   0x1   :  { %v30_v0 = vld [vmem:[%s636_s1] sm:$0xff]  ;;  %v31_v1 = vld [vmem:[%s636_s1 + $0x8] sm:$0xff]  ;;  %v32_v2 = vld [vmem:[%s636_s1 + $0x10] sm:$0xff]  ;;  %v12_v51 = vstv %s641_s6 }
   0x2   :  { %v435_v3 = vpack.c.bf16 %v31_v1, %v30_v0  ;;  %v33_v4 = vld [vmem:[%s636_s1 + $0x18] sm:$0xff]  ;;  %v34_v6 = vld [vmem:[%s636_s1 + $0x20] sm:$0xff]  ;;  %v35_v7 = vld [vmem:[%s636_s1 + $0x28] sm:$0xff]  ;;  %13 = vst [vmem:[#allocation2] sm:$0x1] %v12_v51 }
   0x3   :  { %v439_v5 = vpack.c.bf16 %v33_v4, %v32_v2  ;;  %v443_v8 = vpack.c.bf16 %v35_v7, %v34_v6  ;;  %v36_v9 = vld [vmem:[%s636_s1 + $0x30] sm:$0xff]  ;;  %v37_v10 = vld [vmem:[%s636_s1 + $0x38] sm:$0xff]  ;;  %v28_v11 = vld [vmem:[%s637_s0] sm:$0xff] }
   0x4   :  { %436 = vmatprep.subr.bf16.mxu0 %v435_v3  ;;  %402 = vmatprep.mubr.f32.mxu0 %v28_v11  ;;  %v130_v12 = vld [vmem:[%s638_s3] sm:$0xff]  ;;  %v131_v13 = vld [vmem:[%s638_s3 + $0x8] sm:$0xff]  ;;  %v132_v14 = vld [vmem:[%s638_s3 + $0x10] sm:$0xff]  ;;  %v447_v20 = vpack.c.bf16 %v37_v10, %v36_v9 }
   0x5   :  { %438 = vmatpush3.bf16.msra.mxu0 %v435_v3  ;;  %v467_v15 = vpack.c.bf16 %v131_v13, %v130_v12  ;;  %v133_v16 = vld [vmem:[%s638_s3 + $0x18] sm:$0xff]  ;;  %v134_v18 = vld [vmem:[%s638_s3 + $0x20] sm:$0xff]  ;;  %v135_v19 = vld [vmem:[%s638_s3 + $0x28] sm:$0xff] }
   0x6   :  { %440 = vmatprep.subr.bf16.mxu0 %v439_v5  ;;  %v471_v17 = vpack.c.bf16 %v133_v16, %v132_v14  ;;  %v38_v21 = vld [vmem:[%s636_s1 + $0x40] sm:$0xff]  ;;  %v39_v22 = vld [vmem:[%s636_s1 + $0x48] sm:$0xff]  ;;  %v475_v23 = vpack.c.bf16 %v135_v19, %v134_v18  ;;  %v40_v25 = vld [vmem:[%s636_s1 + $0x50] sm:$0xff] }
   0x7   :  { %468 = vmatprep.subr.bf16.mxu1 %v467_v15  ;;  %v451_v24 = vpack.c.bf16 %v39_v22, %v38_v21  ;;  %v41_v26 = vld [vmem:[%s636_s1 + $0x58] sm:$0xff]  ;;  %v42_v28 = vld [vmem:[%s636_s1 + $0x60] sm:$0xff]  ;;  %v43_v29 = vld [vmem:[%s636_s1 + $0x68] sm:$0xff] }
   0x8   :  { %470 = vmatpush3.bf16.msra.mxu1 %v467_v15  ;;  %v455_v27 = vpack.c.bf16 %v41_v26, %v40_v25  ;;  %v459_v30 = vpack.c.bf16 %v43_v29, %v42_v28  ;;  %v44_v31 = vld [vmem:[%s636_s1 + $0x70] sm:$0xff]  ;;  %v45_v32 = vld [vmem:[%s636_s1 + $0x78] sm:$0xff]  ;;  %v29_v34 = vld [vmem:[%s637_s0 + $0x8] sm:$0xff] }
   0x9   :  { %442 = vmatpush3.bf16.msra.mxu0 %v439_v5  ;;  %472 = vmatprep.subr.bf16.mxu1 %v471_v17  ;;  %v463_v33 = vpack.c.bf16 %v45_v32, %v44_v31  ;;  %v136_v35 = vld [vmem:[%s638_s3 + $0x30] sm:$0xff]  ;;  %v137_v36 = vld [vmem:[%s638_s3 + $0x38] sm:$0xff]  ;;  %v229_v38 = vld [vmem:[%s639_s5] sm:$0xff] }
   0xa   :  { %444 = vmatprep.subr.bf16.mxu0 %v443_v8  ;;  %v479_v37 = vpack.c.bf16 %v137_v36, %v136_v35  ;;  %v230_v39 = vld [vmem:[%s639_s5 + $0x8] sm:$0xff]  ;;  %v329_v41 = vld [vmem:[%s640_s2] ss:$0 sm:$0xff]  ;;  %v231_v48 = vld [vmem:[%s639_s5 + $0x10] sm:$0xff] }
   0xb   :  { %v483_v40 = vpack.c.bf16 %v230_v39, %v229_v38  ;;  %v232_v49 = vld [vmem:[%s639_s5 + $0x18] sm:$0xff]  ;;  %v330_v52 = vld [vmem:[%s642_s4] ss:$0 sm:$0xff] }
   0xc   :  { %474 = vmatpush3.bf16.msra.mxu1 %v471_v17  ;;  %v487_v50 = vpack.c.bf16 %v232_v49, %v231_v48  ;;  %v333_v59 = vld [vmem:[#allocation2] ss:$0 sm:$0xff] }
   0xd   :  { %446 = vmatpush3.bf16.msra.mxu0 %v443_v8  ;;  %476 = vmatprep.subr.bf16.mxu1 %v475_v23 }
   0xe   :  { %448 = vmatprep.subr.bf16.mxu0 %v447_v20 }
  0x10   :  { %478 = vmatpush3.bf16.msra.mxu1 %v475_v23 }
  0x11   :  { %450 = vmatpush3.bf16.msra.mxu0 %v447_v20  ;;  %480 = vmatprep.subr.bf16.mxu1 %v479_v37 }
  0x12   :  { %452 = vmatprep.subr.bf16.mxu0 %v451_v24 }
  0x14   :  { %482 = vmatpush3.bf16.msra.mxu1 %v479_v37 }
  0x15   :  { %454 = vmatpush3.bf16.msra.mxu0 %v451_v24  ;;  %484 = vmatprep.subr.bf16.mxu1 %v483_v40 }
  0x16   :  { %456 = vmatprep.subr.bf16.mxu0 %v455_v27 }
  0x19   :  { %458 = vmatpush3.bf16.msra.mxu0 %v455_v27 }
  0x1a   :  { %460 = vmatprep.subr.bf16.mxu0 %v459_v30 }
  0x1d   :  { %462 = vmatpush3.bf16.msra.mxu0 %v459_v30 }
  0x1e   :  { %464 = vmatprep.subr.bf16.mxu0 %v463_v33 }
  0x21   :  { %466 = vmatpush3.bf16.msra.mxu0 %v463_v33 }
  0x24   :  { %403 = vmatmul.mubr.f32.vlgmr.msra.gmra.mrb[0].mxu0 %v29_v34 }
  0xf7   :  { %v404_v42 = vpop.f32.mrb[0].mxu0 }
  0xf8   :  { %v125_v43 = vadd.f32 %v404_v42, %v329_v41  ;;  %v119_v44 = vpop.f32.mrb[1].mxu0 }
  0xf9   :  { %v120_v45 = vadd.f32 %v329_v41, %v119_v44 }
  0xfa   :  { %v129_v47 = vmax.f32 %v125_v43, 0.0 }
  0xfb   :  { %v128_v46 = vmax.f32 %v120_v45, 0.0 }
  0xfd   :  { %421 = vmatprep.mubr.msk.f32.mxu1 %vm145_vm0, %v128_v46 }
  0xfe   :  { %422 = vmatmul.mubr.msk.f32.vlgmr.msra.gmra.mrb[0].mxu1 %vm145_vm0, %v129_v47 }
  0xff   :  { %486 = vmatpush3.bf16.msra.mxu1 %v483_v40 }
 0x100   :  { %488 = vmatprep.subr.bf16.mxu1 %v487_v50 }
 0x103   :  { %490 = vmatpush3.bf16.msra.mxu1 %v487_v50 }
 0x1d1   :  { %v423_v53 = vpop.f32.mrb[0].mxu1 }
 0x1d2   :  { %v224_v54 = vadd.f32 %v423_v53, %v330_v52  ;;  %v218_v55 = vpop.f32.mrb[1].mxu1 }
 0x1d3   :  { %v219_v56 = vadd.f32 %v330_v52, %v218_v55 }
 0x1d4   :  { %v228_v58 = vmax.f32 %v224_v54, 0.0 }
 0x1d5   :  { %v227_v57 = vmax.f32 %v219_v56, 0.0 }
 0x1d7   :  { %432 = vmatprep.mubr.msk.f32.mxu1 %vm240_vm1, %v227_v57 }
 0x1d8   :  { %433 = vmatmul.mubr.msk.f32.vlgmr.msra.gmra.mrb[2].mxu1 %vm240_vm1, %v228_v58 }
 0x2ab   :  { %v434_v60 = vpop.f32.mrb[2].mxu1 }
 0x2ac   :  { %v319_v61 = vadd.f32 %v434_v60, %v333_v59  ;;  %v313_v62 = vpop.f32.mrb[3].mxu1 }
 0x2ad   :  { %v314_v63 = vadd.f32 %v333_v59, %v313_v62 }
 0x2ae   :  { %324 = vst.msk [vmem:[%s643_s7 + $0x8] sm:$0xff] %vm322_vm2, %v319_v61 }
 0x2af   :  { %323 = vst.msk [vmem:[%s643_s7] sm:$0xff] %vm322_vm2, %v314_v63 }

</bundles_post_ra>
